<compile_context>
chip_gen: v5e
topology: v5e:2x2
jax: 0.10.0
libtpu: 0.0.40
codegen_flags: <defaults>
</compile_context>

<pallas_src>
import jax
import jax.numpy as jnp
from jax import lax
from jax.experimental import pallas as pl
from jax.experimental.pallas import tpu as pltpu

LANES = 128
SUBLANES = 8
_LOG_CLAMP = -100.0


def _cdiv(a: int, b: int) -> int:
    return (a + b - 1) // b


def _tpu_params():
    """Return (tensorcore_count, max_rows_per_tile) for the local TPU generation."""
    kind = ""
    try:
        kind = jax.devices()[0].device_kind.lower()
    except Exception:
        pass
    if "v5 lite" in kind or "v5e" in kind or "v5lite" in kind:
        return 1, 4096          # v5e: 16 MiB scoped-VMEM default -> 8 MiB input buffers
    if "v7" in kind or "tpu7" in kind:
        return 2, 8192          # v7x: 2 TensorCores, 4 MiB/input tile (~16 MiB buffers)
    return 1, 8192              # v6e / other single-TC parts


def _make_kernel(*, total, tm, chunk, tiles, tiles_per_p):
    n_chunks = tm // chunk

    def kernel(p_ref, g_ref, o_ref, acc_ref):
        pid_p = pl.program_id(0)
        pid_j = pl.program_id(1)

        @pl.when(pid_j == 0)
        def _():
            acc_ref[...] = jnp.zeros_like(acc_ref)

        # Unclamped logical block index (the DMA index_map clamps to stay in
        # bounds; the mask below uses the unclamped index so redundant blocks
        # contribute exactly zero).
        blk = pid_p * tiles_per_p + pid_j
        row0 = blk * tm

        # Loop-invariant flat offset of every element within a chunk (hoisted
        # out of the chunk loop).
        flat_l = (lax.broadcasted_iota(jnp.int32, (chunk, LANES), 0) * LANES
                  + lax.broadcasted_iota(jnp.int32, (chunk, LANES), 1))

        def do_chunk(c, carry):
            off = c * chunk
            sl = pl.ds(pl.multiple_of(off, chunk), chunk)
            p = p_ref[sl, :].astype(jnp.float32)
            g = g_ref[sl, :].astype(jnp.float32)

            # Ragged-tail mask: global element index vs. true element count.
            # Masked positions become (p=1, g=1), which contribute exactly 0
            # because each log term is clamped at -100 *before* the multiply.
            valid = (row0 + off) * LANES + flat_l < total
            p = jnp.where(valid, p, 1.0)
            g = jnp.where(valid, g, 1.0)

            log_p = jnp.maximum(jnp.log(p), _LOG_CLAMP)
            log_1mp = jnp.maximum(jnp.log1p(-p), _LOG_CLAMP)
            # s = g*log_p + (1-g)*log_1mp  (the negation is folded into the wrapper)
            s = log_1mp + g * (log_p - log_1mp)

            # VPU-only partial reduce: fold (chunk,128) onto the (8,128)
            # accumulator; the single cross-lane reduce happens once in the tail.
            acc_ref[...] += s.reshape(-1, SUBLANES, LANES).sum(axis=0)
            return carry

        if n_chunks == 1:
            do_chunk(0, 0)
        else:
            lax.fori_loop(0, n_chunks, do_chunk, 0)

        @pl.when(pid_j == pl.num_programs(1) - 1)
        def _():
            o_ref[0, 0] = jnp.sum(acc_ref[...])   # per-partition partial sum

    return kernel


def bce_loss_pallas(predict: jax.Array, gt: jax.Array) -> jax.Array:
    """Mean BCE loss over all elements. Returns a scalar float32."""
    assert predict.shape == gt.shape, "predict/gt shape mismatch"
    total = predict.size
    assert total > 0

    p_flat = predict.reshape(-1)   # metadata-only for contiguous inputs
    g_flat = gt.reshape(-1)

    rem = total % LANES
    if rem:
        # Rare path: pad <128 elements so the lane-dense (rows,128) view is a
        # free reshape; the tail is masked out in-kernel regardless of value.
        pad = LANES - rem
        p_flat = jnp.pad(p_flat, (0, pad), constant_values=1)
        g_flat = jnp.pad(g_flat, (0, pad), constant_values=1)
    rows = p_flat.size // LANES

    n_cores, max_rows = _tpu_params()

    # Sub-32-bit dtypes pack along sublanes: round tile height to the packed
    # sublane multiple (8 f32, 16 bf16/f16, 32 int8/fp8).
    itemsize = jnp.dtype(predict.dtype).itemsize
    sub_mult = SUBLANES * max(1, 4 // itemsize)
    rows_r = _cdiv(rows, sub_mult) * sub_mult
    tm = min(rows_r, max_rows)

    tiles = _cdiv(rows, tm)
    n_par = n_cores if tiles >= n_cores else 1
    tiles_per_p = _cdiv(tiles, n_par)

    # Bound in-kernel intermediates / live vregs for large tiles.
    chunk = 1024 if (tm % 1024 == 0 and tm > 1024) else tm

    p2 = p_flat.reshape(rows, LANES)
    g2 = g_flat.reshape(rows, LANES)

    kernel = _make_kernel(total=total, tm=tm, chunk=chunk, tiles=tiles,
                          tiles_per_p=tiles_per_p)

    def in_map(p, j):
        # Clamp so a redundant trailing block (odd tile count split across the
        # two v7x cores) re-reads the last valid block instead of DMA-ing past
        # the array; its contribution is masked to zero inside the kernel.
        return (jnp.minimum(p * tiles_per_p + j, tiles - 1), 0)

    partials = pl.pallas_call(
        kernel,
        out_shape=jax.ShapeDtypeStruct((n_par, 1), jnp.float32),
        grid_spec=pltpu.PrefetchScalarGridSpec(
            num_scalar_prefetch=0,
            grid=(n_par, tiles_per_p),
            in_specs=[
                pl.BlockSpec((tm, LANES), in_map),
                pl.BlockSpec((tm, LANES), in_map),
            ],
            out_specs=pl.BlockSpec((1, 1), lambda p, j: (p, 0),
                                   memory_space=pltpu.SMEM),
            scratch_shapes=[pltpu.VMEM((SUBLANES, LANES), jnp.float32)],
        ),
        compiler_params=pltpu.CompilerParams(
            dimension_semantics=("parallel", "arbitrary"),
            vmem_limit_bytes=32 * 1024 * 1024,
        ),
    )(p2, g2)

    # Combine per-core partial sums; apply the (folded-out) negation and the
    # mean with the *true* element count.
    return -jnp.sum(partials) / jnp.float32(total)


def bce_loss_ref(predict, gt):
    log_p = jnp.maximum(jnp.log(predict), -100.0)
    log_1mp = jnp.maximum(jnp.log1p(-predict), -100.0)
    return jnp.mean(-(gt * log_p + (1.0 - gt) * log_1mp))


if __name__ == "__main__":
    key = jax.random.PRNGKey(0)
    k1, k2 = jax.random.split(key)

    # Small shapes consistent with a classification head: (B, C, H, W) probabilities.
    shape = (2, 4, 16, 16)
    predict = jax.nn.sigmoid(jax.random.normal(k1, shape, dtype=jnp.float32))
    gt = (jax.random.uniform(k2, shape) > 0.5).astype(jnp.float32)

    loss = bce_loss_pallas(predict, gt)
    jax.block_until_ready(loss)

    ref = bce_loss_ref(predict, gt)
    assert jnp.allclose(loss, ref, rtol=1e-5, atol=1e-5), (loss, ref)

    print("KERNEL_OK")
</pallas_src>

<mosaic_0001>
module attributes {stable_mosaic.version = 11 : i64} {
  func.func @kernel(%arg0: i32, %arg1: i32, %arg2: memref<16x128xf32, #tpu.memory_space<vmem>>, %arg3: memref<16x128xf32, #tpu.memory_space<vmem>>, %arg4: memref<1x1xf32, #tpu.memory_space<smem>>, %arg5: memref<8x128xf32, #tpu.memory_space<vmem>>) attributes {dimension_semantics = [#tpu.dimension_semantics<parallel>, #tpu.dimension_semantics<arbitrary>], iteration_bounds = array<i64: 1, 1>, scalar_prefetch = 0 : i64, scratch_operands = 1 : i64, tpu.core_type = #tpu.core_type<tc>, window_params = [{transform_indices = @transform_0, window_bounds = array<i64: 16, 128>}, {transform_indices = @transform_1, window_bounds = array<i64: 16, 128>}, {transform_indices = @transform_2, window_bounds = array<i64: 1, 1>}]} {
    %c0_i32 = arith.constant 0 : i32
    %0 = arith.cmpi eq, %arg1, %c0_i32 : i32
    %1 = arith.extui %0 : i1 to i32
    %c0_i32_0 = arith.constant 0 : i32
    %2 = arith.cmpi ne, %1, %c0_i32_0 : i32
    scf.if %2 {
      %cst_16 = arith.constant 0.000000e+00 : f32
      %45 = vector.broadcast %cst_16 : f32 to vector<8x128xf32>
      %c0_17 = arith.constant 0 : index
      %c0_18 = arith.constant 0 : index
      %46 = vector.load %arg5[%c0_17, %c0_18] : memref<8x128xf32, #tpu.memory_space<vmem>>, vector<8x128xf32>
      tpu.vector_store %arg5[%c0_17, %c0_18], %45 {strides = array<i32>} : memref<8x128xf32, #tpu.memory_space<vmem>>, vector<8x128xf32>,
    } else {
    }
    %c1_i32 = arith.constant 1 : i32
    %3 = arith.muli %arg0, %c1_i32 : i32
    %4 = arith.addi %3, %arg1 : i32
    %c16_i32 = arith.constant 16 : i32
    %5 = arith.muli %4, %c16_i32 : i32
    %6 = tpu.iota {dimensions = array<i32: 0>} : vector<16x128xi32>
    %c128_i32 = arith.constant 128 : i32
    %7 = vector.broadcast %c128_i32 : i32 to vector<16x128xi32>
    %8 = arith.muli %6, %7 : vector<16x128xi32>
    %9 = tpu.iota {dimensions = array<i32: 1>} : vector<16x128xi32>
    %10 = arith.addi %8, %9 : vector<16x128xi32>
    %c0_i32_1 = arith.constant 0 : i32
    %11 = tpu.assume_multiple %c0_i32_1, 16 : i32
    %12 = arith.index_cast %11 : i32 to index
    %c0 = arith.constant 0 : index
    %13 = vector.load %arg2[%12, %c0] : memref<16x128xf32, #tpu.memory_space<vmem>>, vector<16x128xf32>
    %14 = arith.index_cast %11 : i32 to index
    %c0_2 = arith.constant 0 : index
    %15 = vector.load %arg3[%14, %c0_2] : memref<16x128xf32, #tpu.memory_space<vmem>>, vector<16x128xf32>
    %c0_i32_3 = arith.constant 0 : i32
    %16 = arith.addi %5, %c0_i32_3 : i32
    %c128_i32_4 = arith.constant 128 : i32
    %17 = arith.muli %16, %c128_i32_4 : i32
    %18 = vector.broadcast %17 : i32 to vector<16x128xi32>
    %19 = arith.addi %18, %10 : vector<16x128xi32>
    %c2048_i32 = arith.constant 2048 : i32
    %20 = vector.broadcast %c2048_i32 : i32 to vector<16x128xi32>
    %21 = arith.cmpi slt, %19, %20 : vector<16x128xi32>
    %cst = arith.constant 1.000000e+00 : f32
    %22 = vector.broadcast %cst : f32 to vector<16x128xf32>
    %23 = arith.select %21, %13, %22 : vector<16x128xi1>, vector<16x128xf32>
    %cst_5 = arith.constant 1.000000e+00 : f32
    %24 = vector.broadcast %cst_5 : f32 to vector<16x128xf32>
    %25 = arith.select %21, %15, %24 : vector<16x128xi1>, vector<16x128xf32>
    %26 = math.log %23 : vector<16x128xf32>
    %cst_6 = arith.constant -1.000000e+02 : f32
    %27 = vector.broadcast %cst_6 : f32 to vector<16x128xf32>
    %28 = arith.maximumf %26, %27 : vector<16x128xf32>
    %cst_7 = arith.constant 0.000000e+00 : f32
    %29 = vector.broadcast %cst_7 : f32 to vector<16x128xf32>
    %30 = arith.subf %29, %23 : vector<16x128xf32>
    %31 = math.log1p %30 : vector<16x128xf32>
    %cst_8 = arith.constant -1.000000e+02 : f32
    %32 = vector.broadcast %cst_8 : f32 to vector<16x128xf32>
    %33 = arith.maximumf %31, %32 : vector<16x128xf32>
    %34 = arith.subf %28, %33 : vector<16x128xf32>
    %35 = arith.mulf %25, %34 : vector<16x128xf32>
    %36 = arith.addf %33, %35 : vector<16x128xf32>
    %c0_9 = arith.constant 0 : index
    %c0_10 = arith.constant 0 : index
    %37 = vector.load %arg5[%c0_9, %c0_10] : memref<8x128xf32, #tpu.memory_space<vmem>>, vector<8x128xf32>
    %38 = vector.shape_cast %36 : vector<16x128xf32> to vector<2x8x128xf32>
    %cst_11 = arith.constant dense<0.000000e+00> : vector<8x128xf32>
    %39 = vector.multi_reduction <add>, %38, %cst_11 [0] : vector<2x8x128xf32> to vector<8x128xf32>
    %40 = arith.addf %37, %39 : vector<8x128xf32>
    %c0_12 = arith.constant 0 : index
    %c0_13 = arith.constant 0 : index
    %41 = vector.load %arg5[%c0_12, %c0_13] : memref<8x128xf32, #tpu.memory_space<vmem>>, vector<8x128xf32>
    tpu.vector_store %arg5[%c0_12, %c0_13], %40 {strides = array<i32>} : memref<8x128xf32, #tpu.memory_space<vmem>>, vector<8x128xf32>,
    %c0_i32_14 = arith.constant 0 : i32
    %42 = arith.cmpi eq, %arg1, %c0_i32_14 : i32
    %43 = arith.extui %42 : i1 to i32
    %c0_i32_15 = arith.constant 0 : i32
    %44 = arith.cmpi ne, %43, %c0_i32_15 : i32
    scf.if %44 {
      %c0_16 = arith.constant 0 : index
      %c0_17 = arith.constant 0 : index
      %45 = vector.load %arg5[%c0_16, %c0_17] : memref<8x128xf32, #tpu.memory_space<vmem>>, vector<8x128xf32>
      %46 = vector.shape_cast %45 : vector<8x128xf32> to vector<1x8x128xf32>
      %cst_18 = arith.constant dense<0.000000e+00> : vector<1xf32>
      %47 = vector.multi_reduction <add>, %46, %cst_18 [1, 2] : vector<1x8x128xf32> to vector<1xf32>
      %48 = vector.shape_cast %47 : vector<1xf32> to vector<1x1x1xf32>
      %49 = vector.extract %48[0, 0, 0] : f32 from vector<1x1x1xf32>
      %c0_19 = arith.constant 0 : index
      %c0_20 = arith.constant 0 : index
      %50 = memref.load %arg4[%c0_19, %c0_20] : memref<1x1xf32, #tpu.memory_space<smem>>
      memref.store %49, %arg4[%c0_19, %c0_20] : memref<1x1xf32, #tpu.memory_space<smem>>
    } else {
    }
    return
  }
  func.func @transform_0(%arg0: i32, %arg1: i32) -> (i32, i32) {
    %c1_i32 = arith.constant 1 : i32
    %0 = arith.muli %arg0, %c1_i32 : i32
    %1 = arith.addi %0, %arg1 : i32
    %c0_i32 = arith.constant 0 : i32
    %2 = arith.minsi %1, %c0_i32 : i32
    %c0_i32_0 = arith.constant 0 : i32
    %c0_i32_1 = arith.constant 0 : i32
    return %2, %c0_i32_0 : i32, i32
  }
  func.func @transform_1(%arg0: i32, %arg1: i32) -> (i32, i32) {
    %c1_i32 = arith.constant 1 : i32
    %0 = arith.muli %arg0, %c1_i32 : i32
    %1 = arith.addi %0, %arg1 : i32
    %c0_i32 = arith.constant 0 : i32
    %2 = arith.minsi %1, %c0_i32 : i32
    %c0_i32_0 = arith.constant 0 : i32
    %c0_i32_1 = arith.constant 0 : i32
    return %2, %c0_i32_0 : i32, i32
  }
  func.func @transform_2(%arg0: i32, %arg1: i32) -> (i32, i32) {
    %c0_i32 = arith.constant 0 : i32
    %c0_i32_0 = arith.constant 0 : i32
    return %arg0, %c0_i32 : i32, i32
  }
}

</mosaic_0001>

<bundles_post_ra>
// kernel: tpu_custom_call.1
= control target key start
LH: loop header
LB: loop body
LE: loop exit
PB: predicated region body
PF: predicated region fallthrough
CT: control target
= control target key end

     0   :  { %7 = vsyncpa [#allocation4], 0  ;;  %s281_s0 = inlined_call_operand.hbm [shape: f32[16,128], index: 0, kind: input, shape index: {}]   ;;  %s282_s1 = inlined_call_operand.hbm [shape: f32[16,128], index: 1, kind: input, shape index: {}]   ;;  %s283_s2 = inlined_call_operand.hbm [shape: f32[1,1], index: 2, kind: output, shape index: {}]  }
   0x1   :  { %8 = vsyncpa [#allocation7], 0 }
   0x2   :  { %9 = vsyncpa [#allocation5], 0  ;;  %s20_s11 = sshll.u32 %s281_s0, 4  ;;  %s248_s12 = smov [#allocation3]   ;;  %s21_s11 = int_to_ptr.hbm [resolvable:$true] %s20_s11 }
   0x3   :  { %s22_s13 = sshll.u32 %s248_s12, 4  ;;  %s39_s16 = sshll.u32 %s282_s1, 4  ;;  %s23_s13 = int_to_ptr.vmem [resolvable:$true] %s22_s13  ;;  %s40_s16 = int_to_ptr.hbm [resolvable:$true] %s39_s16 }
   0x4   :  { %s249_s17 = smov 128   ;;  %s250_s18 = smov 8  }
   0x5   :  { %28 = dma.hbm_to_vmem [thread:$0]  %s21_s11, 256, %s23_s13, [#allocation4], %s249_s17, %s249_s17, %s250_s18  }
   0x6   :  { %s251_s19 = smov [#allocation6]  }
   0x7   :  { %s41_s20 = sshll.u32 %s251_s19, 4  ;;  %s42_s20 = int_to_ptr.vmem [resolvable:$true] %s41_s20 }
   0x8   :  { %47 = dma.hbm_to_vmem [thread:$0]  %s40_s16, 256, %s42_s20, [#allocation7], %s249_s17, %s249_s17, %s250_s18  }
   0x9   :  { %242 = dma.done.wait [#allocation4], 256  }
   0xa   :  { %243 = vsyncadd [#allocation4], 4294967040 }
   0xb   :  { %244 = dma.done.wait [#allocation7], 256  }
   0xc   :  { %245 = vsyncadd [#allocation7], 4294967040  ;;  %v70_v0 = vlaneseq  ;;  %v79_v7 = vld [vmem:[#allocation3] sm:$0xff]  ;;  %v80_v9 = vld [vmem:[#allocation3 + $0x8] sm:$0xff]  ;;  %s151_s21 = sshll.u32 %s283_s2, 4  ;;  %s252_s23 = smov [#allocation8]   ;;  %s152_s21 = int_to_ptr.hbm [resolvable:$true] %s151_s21 }
   0xd   :  { %v81_v31 = vld [vmem:[#allocation6] sm:$0xff]  ;;  %v82_v35 = vld [vmem:[#allocation6 + $0x8] sm:$0xff] }
   0xe   :  { %v71_v1 = vshrl.u32 %v70_v0, 7  ;;  %v76_v2 = vand.u32 127, %v70_v0 }
  0x10   :  { %v72_v3 = vadd.s32 8, %v71_v1  ;;  %v73_v4 = vmul.u32 128, %v71_v1 }
  0x12   :  { %v74_v5 = vmul.u32 128, %v72_v3  ;;  %v77_v6 = vadd.s32 %v76_v2, %v73_v4 }
  0x14   :  { %v78_v8 = vadd.s32 %v76_v2, %v74_v5  ;;  %vm87_vm0 = vcmp.lt.s32.totalorder %v77_v6, 2048 }
  0x15   :  { %v89_v10 = vsel %vm87_vm0, %v79_v7, 1.0  ;;  %v91_v38 = vsel %vm87_vm0, %v81_v31, 1.0 }
  0x16   :  { %vm88_vm1 = vcmp.lt.s32.totalorder %v78_v8, 2048  ;;  %174 = vlog2.f32 %v89_v10  ;;  %v99_v11 = vsub.f32 0.0, %v89_v10 }
  0x17   :  { %v90_v12 = vsel %vm88_vm1, %v80_v9, 1.0  ;;  %v92_v42 = vsel %vm88_vm1, %v82_v35, 1.0 }
  0x18   :  { %176 = vlog2.f32 %v90_v12  ;;  %v100_v13 = vsub.f32 0.0, %v90_v12  ;;  %v101_v14 = vadd.f32 1.0, %v99_v11  ;;  %v104_v15 = vmul.f32 -0.5, %v99_v11 }
  0x19   :  { %v107_v20 = vand.u32 2147483647, %v99_v11 }
  0x1a   :  { %178 = vlog2.f32 %v101_v14  ;;  %v110_v16 = vadd.f32 1.0, %v100_v13  ;;  %v113_v17 = vmul.f32 -0.5, %v100_v13  ;;  %v105_v18 = vadd.f32 1.0, %v104_v15 }
  0x1b   :  { %v116_v24 = vand.u32 2147483647, %v100_v13  ;;  %vm108_vm2 = vcmp.lt.f32.partialorder %v107_v20, 0.0004427343 }
  0x1c   :  { %v175_v19 = vpop.eup %174  ;;  %180 = vlog2.f32 %v110_v16  ;;  %v114_v21 = vadd.f32 1.0, %v113_v17  ;;  %v106_v25 = vmul.f32 %v105_v18, %v99_v11 }
  0x1d   :  { %v94_v23 = vmul.f32 0.6931472, %v175_v19  ;;  %vm117_vm3 = vcmp.lt.f32.partialorder %v116_v24, 0.0004427343 }
  0x1e   :  { %v177_v22 = vpop.eup %176  ;;  %v115_v29 = vmul.f32 %v114_v21, %v100_v13 }
  0x1f   :  { %v96_v27 = vmul.f32 0.6931472, %v177_v22  ;;  %v97_v32 = vmax.f32 %v94_v23, -100.0 }
  0x20   :  { %v179_v26 = vpop.eup %178 }
  0x21   :  { %v103_v28 = vmul.f32 0.6931472, %v179_v26  ;;  %v98_v36 = vmax.f32 %v96_v27, -100.0 }
  0x22   :  { %v181_v30 = vpop.eup %180 }
  0x23   :  { %v109_v33 = vsel %vm108_vm2, %v106_v25, %v103_v28  ;;  %v112_v34 = vmul.f32 0.6931472, %v181_v30 }
  0x24   :  { %v119_v37 = vmax.f32 %v109_v33, -100.0 }
  0x25   :  { %v118_v39 = vsel %vm117_vm3, %v115_v29, %v112_v34 }
  0x26   :  { %v120_v40 = vmax.f32 %v118_v39, -100.0  ;;  %v121_v41 = vsub.f32 %v97_v32, %v119_v37 }
  0x28   :  { %v122_v43 = vsub.f32 %v98_v36, %v120_v40  ;;  %v123_v44 = vmul.f32 %v121_v41, %v91_v38 }
  0x2a   :  { %v124_v45 = vmul.f32 %v122_v43, %v92_v42  ;;  %v125_v46 = vadd.f32 %v123_v44, %v119_v37 }
  0x2c   :  { %v126_v47 = vadd.f32 %v124_v45, %v120_v40 }
  0x2e   :  { %v128_v48 = vadd.f32 %v126_v47, %v125_v46 }
  0x30   :  { %135 = vadd.xlane.f32.xlu0 %v128_v48 }
  0xa3   :  { %v136_v49 = vpop.xlane.xlu0 %135 }
  0xa4   :  { %v137_v50 = vrot.slane %v136_v49, 4 }
  0xa6   :  { %v138_v51 = vadd.f32 %v137_v50, %v136_v49 }
  0xa8   :  { %v139_v52 = vrot.slane %v138_v51, 2 }
  0xaa   :  { %v140_v53 = vadd.f32 %v139_v52, %v138_v51 }
  0xac   :  { %v141_v54 = vrot.slane %v140_v53, 1 }
  0xae   :  { %v142_v55 = vadd.f32 %v141_v54, %v140_v53 }
  0xb0   :  { %167 = vpush %v142_v55 }
  0xe1   :  { %s168_s22 = spop %167 }
  0xe2   :  { %145 = sst [smem:[#allocation8]] %s168_s22 }
  0xe3   :  { %154 = dma.smem_to_hbm %s252_s23, 16, %s152_s21, [#allocation5]  }
  0xe4   :  { %246 = dma.done.wait [#allocation5], 16  }
  0xe5   :  { %247 = vsyncadd [#allocation5], 4294967280 }
  0xe6   :  { %159 = sfence }
  0xe7   :  { %160 = vsyncpa [#allocation4], 1 }
  0xe8   :  { %161 = vsyncpa [#allocation7], 1 }
  0xe9   :  { %162 = vsyncpa [#allocation5], 1 }

</bundles_post_ra>
